<compile_context>
chip_gen: v7x
topology: tpu7x:2x2x1
jax: 0.10.0
libtpu: 0.0.40
codegen_flags: <defaults>
</compile_context>

<pallas_src>
import jax
import jax.numpy as jnp
from jax.experimental import pallas as pl
from jax.experimental.pallas import tpu as pltpu

H1 = 256                        # fc1 width
H2 = 128                        # fc2 width
LANE = 128                      # TPU lane width
SINGLE_TILE_MAX = 256           # below this, one batch tile (latency-bound rollouts)
VMEM_BUDGET = 40 * 1024 * 1024  # conservative vs v7x's 64 MiB physical VMEM


def _round_up(v, m):
    return (v + m - 1) // m * m


def net_kernel(x_ref, w1_ref, b1_ref, w2_ref, b2_ref, wh_ref, bh_ref, out_ref):
    """One batch tile: fc1+relu, fc2+relu, fused (action|value|pad) head."""
    cdtype = w1_ref.dtype          # MXU operand dtype (bf16 or f32)

    x = x_ref[...]                                                        # (TB, n_obs)

    # fc1 + relu  (f32 accumulation; bias-add + relu in f32; cast only for next MXU op)
    h1 = jnp.dot(x, w1_ref[...], preferred_element_type=jnp.float32)     # (TB, 256)
    h1 = jnp.maximum(h1 + b1_ref[...], 0.0).astype(cdtype)

    # fc2 + relu
    h2 = jnp.dot(h1, w2_ref[...], preferred_element_type=jnp.float32)    # (TB, 128)
    h2 = jnp.maximum(h2 + b2_ref[...], 0.0).astype(cdtype)

    # fused action/value head -> lane-dense (TB, 128) slab, single unmasked store
    out = jnp.dot(h2, wh_ref[...], preferred_element_type=jnp.float32)   # (TB, 128)
    out_ref[...] = (out + bh_ref[...]).astype(out_ref.dtype)


def prepare_params(params, *, compute_dtype=jnp.bfloat16):
    """Per-parameter-update work, hoisted out of the forward path.

    Packs the fused zero-padded head [Wa | Wv | 0...] and casts the weights to
    the MXU operand dtype. Call once per optimizer step (or once for inference);
    net_forward() consumes the result every step with zero extra wrapper ops.
    """
    n_actions = params["wa"].shape[1]
    head_out = n_actions + 1                           # action columns + value column
    head_pad = max(LANE, _round_up(head_out, LANE))    # lane-dense head width

    wh = jnp.zeros((H2, head_pad), compute_dtype)
    wh = wh.at[:, :n_actions].set(params["wa"].astype(compute_dtype))
    wh = wh.at[:, n_actions:head_out].set(params["wv"].astype(compute_dtype))
    bh = jnp.zeros((1, head_pad), jnp.float32)
    bh = bh.at[:, :n_actions].set(params["ba"].astype(jnp.float32))
    bh = bh.at[:, n_actions:head_out].set(params["bv"].astype(jnp.float32))

    return dict(
        w1=params["w1"].astype(compute_dtype),
        b1=params["b1"].astype(jnp.float32),           # biases stay f32 (v5e-safe elementwise)
        w2=params["w2"].astype(compute_dtype),
        b2=params["b2"].astype(jnp.float32),
        wh=wh,
        bh=bh,
        n_actions=n_actions,
        head_pad=head_pad,
        compute_dtype=jnp.dtype(compute_dtype),
    )


def _vmem_estimate(tb, n_obs, head_pad, in_bytes, out_bytes):
    """Rough per-grid-step VMEM footprint: double-buffered x/out, weights, temporaries."""
    weight_bytes = (n_obs * H1 + H1 * H2 + H2 * head_pad) * in_bytes + (H1 + H2 + head_pad) * 4
    io = 2 * tb * n_obs * in_bytes + 2 * tb * head_pad * out_bytes   # double-buffered streams
    acts = tb * (H1 + H2) * (4 + in_bytes)                           # f32 h1/h2 + cast copies
    return io + 2 * weight_bytes + acts + (2 << 20)                  # + margin


def net_forward(x, prep, *, tile_b=4096, out_dtype=None):
    """A2C Net forward pass as a single Pallas TPU kernel.

    x: (batch, n_obs) float32
    prep: output of prepare_params()
    returns (action_scores (batch, n_actions), state_values (batch, 1)) in out_dtype
    (defaults to the compute dtype; pass jnp.float32 for full-precision outputs).
    """
    B, n_obs = x.shape
    n_actions = prep["n_actions"]
    head_pad = prep["head_pad"]
    head_out = n_actions + 1
    compute_dtype = prep["compute_dtype"]
    if out_dtype is None:
        out_dtype = compute_dtype
    in_bytes = jnp.dtype(compute_dtype).itemsize
    out_bytes = jnp.dtype(out_dtype).itemsize

    xk = x.astype(compute_dtype)

    # --- batch tiling: no wrapper-side pad; Pallas masks the ragged last block ---
    if B <= SINGLE_TILE_MAX:
        TB = B                                   # tiny rollout batches: single tile
    else:
        # at least 2 tiles so the "parallel" axis spans both TensorCores on v7x
        TB = min(tile_b, _round_up((B + 1) // 2, 8))
        # shrink the tile if the VMEM estimate exceeds the (v7x-safe) budget
        while TB > 256 and _vmem_estimate(TB, n_obs, head_pad, in_bytes, out_bytes) > VMEM_BUDGET:
            TB = _round_up(TB // 2, 8)
    num_tiles = pl.cdiv(B, TB)

    vmem_limit = int(min(
        60 * 1024 * 1024,
        max(2 * _vmem_estimate(TB, n_obs, head_pad, in_bytes, out_bytes), 16 * 1024 * 1024),
    ))

    weight_elems = n_obs * H1 + H1 * H2 + H2 * head_pad
    cost = pl.CostEstimate(
        flops=2 * B * weight_elems,
        transcendentals=0,
        bytes_accessed=int(B * n_obs * in_bytes            # x
                           + weight_elems * in_bytes       # weights
                           + (H1 + H2 + head_pad) * 4      # biases (f32)
                           + B * head_pad * out_bytes),    # fused output
    )

    fused = pl.pallas_call(
        net_kernel,
        out_shape=jax.ShapeDtypeStruct((B, head_pad), out_dtype),
        grid=(num_tiles,),
        in_specs=[
            pl.BlockSpec((TB, n_obs), lambda i: (i, 0)),        # x: streamed over batch
            pl.BlockSpec((n_obs, H1), lambda i: (0, 0)),        # W1: VMEM-resident
            pl.BlockSpec((1, H1), lambda i: (0, 0)),            # b1
            pl.BlockSpec((H1, H2), lambda i: (0, 0)),           # W2
            pl.BlockSpec((1, H2), lambda i: (0, 0)),            # b2
            pl.BlockSpec((H2, head_pad), lambda i: (0, 0)),     # fused head W
            pl.BlockSpec((1, head_pad), lambda i: (0, 0)),      # fused head b
        ],
        out_specs=pl.BlockSpec((TB, head_pad), lambda i: (i, 0)),
        compiler_params=pltpu.CompilerParams(
            dimension_semantics=("parallel",),                  # megacore split on v7x
            vmem_limit_bytes=vmem_limit,
        ),
        cost_estimate=cost,
    )(xk, prep["w1"], prep["b1"], prep["w2"], prep["b2"], prep["wh"], prep["bh"])

    action_scores = fused[:, :n_actions]
    state_values = fused[:, n_actions:head_out]
    return action_scores, state_values


def init_params(key, n_obs, n_actions):
    """Deterministic synthetic parameter init (PyTorch-Linear-like uniform)."""
    ks = jax.random.split(key, 8)

    def lin(kw, kb, fan_in, fan_out):
        scale = 1.0 / jnp.sqrt(jnp.float32(fan_in))
        w = jax.random.uniform(kw, (fan_in, fan_out), jnp.float32, -scale, scale)
        b = jax.random.uniform(kb, (1, fan_out), jnp.float32, -scale, scale)
        return w, b

    w1, b1 = lin(ks[0], ks[1], n_obs, H1)
    w2, b2 = lin(ks[2], ks[3], H1, H2)
    wa, ba = lin(ks[4], ks[5], H2, n_actions)
    wv, bv = lin(ks[6], ks[7], H2, 1)
    return dict(w1=w1, b1=b1, w2=w2, b2=b2, wa=wa, ba=ba, wv=wv, bv=bv)


def net_forward_ref(x, p):
    """Pure-JAX f32 reference for correctness checking."""
    h1 = jnp.maximum(x @ p["w1"] + p["b1"], 0.0)
    h2 = jnp.maximum(h1 @ p["w2"] + p["b2"], 0.0)
    return h2 @ p["wa"] + p["ba"], h2 @ p["wv"] + p["bv"]


if __name__ == "__main__":
    batch, n_obs, n_actions = 8, 32, 8

    key = jax.random.PRNGKey(0)
    kx, kp = jax.random.split(key)

    x = jax.random.normal(kx, (batch, n_obs), dtype=jnp.float32)
    params = init_params(kp, n_obs, n_actions)
    ref_act, ref_val = net_forward_ref(x, params)

    # 1) Default path: bf16 MXU operands (f32 accumulation) + bf16 lane-dense output.
    prep_bf16 = prepare_params(params)                       # compute_dtype=bfloat16
    act, val = net_forward(x, prep_bf16)
    jax.block_until_ready((act, val))
    assert act.shape == (batch, n_actions)
    assert val.shape == (batch, 1)
    assert jnp.allclose(act.astype(jnp.float32), ref_act, atol=5e-2, rtol=5e-2)
    assert jnp.allclose(val.astype(jnp.float32), ref_val, atol=5e-2, rtol=5e-2)

    # 2) Full-precision path (f32 operands + f32 output) — tight tolerance.
    prep_f32 = prepare_params(params, compute_dtype=jnp.float32)
    act32, val32 = net_forward(x, prep_f32)
    jax.block_until_ready((act32, val32))
    assert jnp.allclose(act32, ref_act, atol=1e-5, rtol=1e-5)
    assert jnp.allclose(val32, ref_val, atol=1e-5, rtol=1e-5)

    # 3) Multi-tile grid with a ragged last block (B=260 -> TB=136, grid=(2,)):
    #    exercises the "parallel" axis (both TCs on v7x) and Pallas's masked
    #    boundary-block handling (no wrapper-side pad).
    xg = jax.random.normal(kx, (260, n_obs), dtype=jnp.float32)
    ref_actg, ref_valg = net_forward_ref(xg, params)
    actg, valg = net_forward(xg, prep_f32)
    jax.block_until_ready((actg, valg))
    assert actg.shape == (260, n_actions)
    assert valg.shape == (260, 1)
    assert jnp.allclose(actg, ref_actg, atol=1e-5, rtol=1e-5)
    assert jnp.allclose(valg, ref_valg, atol=1e-5, rtol=1e-5)

    print("KERNEL_OK")
</pallas_src>

<mosaic_0001>
module attributes {stable_mosaic.version = 11 : i64} {
  func.func @net_kernel(%arg0: i32, %arg1: memref<8x32xbf16, #tpu.memory_space<vmem>>, %arg2: memref<32x256xbf16, #tpu.memory_space<vmem>>, %arg3: memref<1x256xf32, #tpu.memory_space<vmem>>, %arg4: memref<256x128xbf16, #tpu.memory_space<vmem>>, %arg5: memref<1x128xf32, #tpu.memory_space<vmem>>, %arg6: memref<128x128xbf16, #tpu.memory_space<vmem>>, %arg7: memref<1x128xf32, #tpu.memory_space<vmem>>, %arg8: memref<8x128xbf16, #tpu.memory_space<vmem>>) attributes {dimension_semantics = [#tpu.dimension_semantics<parallel>], iteration_bounds = array<i64: 1>, scalar_prefetch = 0 : i64, scratch_operands = 0 : i64, tpu.core_type = #tpu.core_type<tc>, window_params = [{transform_indices = @transform_0, window_bounds = array<i64: 8, 32>}, {pipeline_mode = #tpu.pipeline_mode<synchronous>, transform_indices = @transform_1, window_bounds = array<i64: 32, 256>}, {pipeline_mode = #tpu.pipeline_mode<synchronous>, transform_indices = @transform_2, window_bounds = array<i64: 1, 256>}, {pipeline_mode = #tpu.pipeline_mode<synchronous>, transform_indices = @transform_3, window_bounds = array<i64: 256, 128>}, {pipeline_mode = #tpu.pipeline_mode<synchronous>, transform_indices = @transform_4, window_bounds = array<i64: 1, 128>}, {pipeline_mode = #tpu.pipeline_mode<synchronous>, transform_indices = @transform_5, window_bounds = array<i64: 128, 128>}, {pipeline_mode = #tpu.pipeline_mode<synchronous>, transform_indices = @transform_6, window_bounds = array<i64: 1, 128>}, {transform_indices = @transform_7, window_bounds = array<i64: 8, 128>}]} {
    %c0 = arith.constant 0 : index
    %c0_0 = arith.constant 0 : index
    %0 = vector.load %arg1[%c0, %c0_0] : memref<8x32xbf16, #tpu.memory_space<vmem>>, vector<8x32xbf16>
    %c0_1 = arith.constant 0 : index
    %c0_2 = arith.constant 0 : index
    %1 = vector.load %arg2[%c0_1, %c0_2] : memref<32x256xbf16, #tpu.memory_space<vmem>>, vector<32x256xbf16>
    %cst = arith.constant dense<0.000000e+00> : vector<8x256xf32>
    %2 = tpu.matmul %0, %1, %cst {dimension_numbers = #tpu.dot_dimension_numbers<[1], [0], [0], [1], [0, 0, 1, 1], [], []>} : vector<8x32xbf16>, vector<32x256xbf16>, vector<8x256xf32> -> vector<8x256xf32>
    %c0_3 = arith.constant 0 : index
    %c0_4 = arith.constant 0 : index
    %3 = vector.load %arg3[%c0_3, %c0_4] : memref<1x256xf32, #tpu.memory_space<vmem>>, vector<1x256xf32>
    %4 = vector.broadcast %3 : vector<1x256xf32> to vector<8x256xf32>
    %5 = arith.addf %2, %4 : vector<8x256xf32>
    %cst_5 = arith.constant 0.000000e+00 : f32
    %6 = vector.broadcast %cst_5 : f32 to vector<8x256xf32>
    %7 = arith.maximumf %5, %6 : vector<8x256xf32>
    %8 = arith.truncf %7 : vector<8x256xf32> to vector<8x256xbf16>
    %c0_6 = arith.constant 0 : index
    %c0_7 = arith.constant 0 : index
    %9 = vector.load %arg4[%c0_6, %c0_7] : memref<256x128xbf16, #tpu.memory_space<vmem>>, vector<256x128xbf16>
    %cst_8 = arith.constant dense<0.000000e+00> : vector<8x128xf32>
    %10 = tpu.matmul %8, %9, %cst_8 {dimension_numbers = #tpu.dot_dimension_numbers<[1], [0], [0], [1], [0, 0, 1, 1], [], []>} : vector<8x256xbf16>, vector<256x128xbf16>, vector<8x128xf32> -> vector<8x128xf32>
    %c0_9 = arith.constant 0 : index
    %c0_10 = arith.constant 0 : index
    %11 = vector.load %arg5[%c0_9, %c0_10] : memref<1x128xf32, #tpu.memory_space<vmem>>, vector<1x128xf32>
    %12 = vector.broadcast %11 : vector<1x128xf32> to vector<8x128xf32>
    %13 = arith.addf %10, %12 : vector<8x128xf32>
    %cst_11 = arith.constant 0.000000e+00 : f32
    %14 = vector.broadcast %cst_11 : f32 to vector<8x128xf32>
    %15 = arith.maximumf %13, %14 : vector<8x128xf32>
    %16 = arith.truncf %15 : vector<8x128xf32> to vector<8x128xbf16>
    %c0_12 = arith.constant 0 : index
    %c0_13 = arith.constant 0 : index
    %17 = vector.load %arg6[%c0_12, %c0_13] : memref<128x128xbf16, #tpu.memory_space<vmem>>, vector<128x128xbf16>
    %cst_14 = arith.constant dense<0.000000e+00> : vector<8x128xf32>
    %18 = tpu.matmul %16, %17, %cst_14 {dimension_numbers = #tpu.dot_dimension_numbers<[1], [0], [0], [1], [0, 0, 1, 1], [], []>} : vector<8x128xbf16>, vector<128x128xbf16>, vector<8x128xf32> -> vector<8x128xf32>
    %c0_15 = arith.constant 0 : index
    %c0_16 = arith.constant 0 : index
    %19 = vector.load %arg7[%c0_15, %c0_16] : memref<1x128xf32, #tpu.memory_space<vmem>>, vector<1x128xf32>
    %20 = vector.broadcast %19 : vector<1x128xf32> to vector<8x128xf32>
    %21 = arith.addf %18, %20 : vector<8x128xf32>
    %22 = arith.truncf %21 : vector<8x128xf32> to vector<8x128xbf16>
    %c0_17 = arith.constant 0 : index
    %c0_18 = arith.constant 0 : index
    %23 = vector.load %arg8[%c0_17, %c0_18] : memref<8x128xbf16, #tpu.memory_space<vmem>>, vector<8x128xbf16>
    tpu.vector_store %arg8[%c0_17, %c0_18], %22 {strides = array<i32>} : memref<8x128xbf16, #tpu.memory_space<vmem>>, vector<8x128xbf16>,
    return
  }
  func.func @transform_0(%arg0: i32) -> (i32, i32) {
    %c0_i32 = arith.constant 0 : i32
    %c0_i32_0 = arith.constant 0 : i32
    return %arg0, %c0_i32 : i32, i32
  }
  func.func @transform_1(%arg0: i32) -> (i32, i32) {
    %c0_i32 = arith.constant 0 : i32
    %c0_i32_0 = arith.constant 0 : i32
    %c0_i32_1 = arith.constant 0 : i32
    return %c0_i32, %c0_i32_0 : i32, i32
  }
  func.func @transform_2(%arg0: i32) -> (i32, i32) {
    %c0_i32 = arith.constant 0 : i32
    %c0_i32_0 = arith.constant 0 : i32
    %c0_i32_1 = arith.constant 0 : i32
    return %c0_i32, %c0_i32_0 : i32, i32
  }
  func.func @transform_3(%arg0: i32) -> (i32, i32) {
    %c0_i32 = arith.constant 0 : i32
    %c0_i32_0 = arith.constant 0 : i32
    %c0_i32_1 = arith.constant 0 : i32
    return %c0_i32, %c0_i32_0 : i32, i32
  }
  func.func @transform_4(%arg0: i32) -> (i32, i32) {
    %c0_i32 = arith.constant 0 : i32
    %c0_i32_0 = arith.constant 0 : i32
    %c0_i32_1 = arith.constant 0 : i32
    return %c0_i32, %c0_i32_0 : i32, i32
  }
  func.func @transform_5(%arg0: i32) -> (i32, i32) {
    %c0_i32 = arith.constant 0 : i32
    %c0_i32_0 = arith.constant 0 : i32
    %c0_i32_1 = arith.constant 0 : i32
    return %c0_i32, %c0_i32_0 : i32, i32
  }
  func.func @transform_6(%arg0: i32) -> (i32, i32) {
    %c0_i32 = arith.constant 0 : i32
    %c0_i32_0 = arith.constant 0 : i32
    %c0_i32_1 = arith.constant 0 : i32
    return %c0_i32, %c0_i32_0 : i32, i32
  }
  func.func @transform_7(%arg0: i32) -> (i32, i32) {
    %c0_i32 = arith.constant 0 : i32
    %c0_i32_0 = arith.constant 0 : i32
    return %arg0, %c0_i32 : i32, i32
  }
}

</mosaic_0001>

<bundles_post_ra>
// kernel: tpu_custom_call.1
= control target key start
LH: loop header
LB: loop body
LE: loop exit
PB: predicated region body
PF: predicated region fallthrough
CT: control target
= control target key end

     0   :  { %12 = vsyncpa [#allocation3], 0  ;;  %s837_s0 = inlined_call_operand.hbm [shape: bf16[8,32], index: 0, kind: input, shape index: {}]   ;;  %s838_s1 = inlined_call_operand.hbm [shape: bf16[32,256], index: 1, kind: input, shape index: {}]   ;;  %s839_s2 = inlined_call_operand.vmem [shape: f32[1,256], index: 2, kind: input, shape index: {}]   ;;  %s840_s3 = inlined_call_operand.hbm [shape: bf16[256,128], index: 3, kind: input, shape index: {}]   ;;  %s841_s4 = inlined_call_operand.vmem [shape: f32[1,128], index: 4, kind: input, shape index: {}]   ;;  %s842_s5 = inlined_call_operand.hbm [shape: bf16[128,128], index: 5, kind: input, shape index: {}]   ;;  %s843_s6 = inlined_call_operand.vmem [shape: f32[1,128], index: 6, kind: input, shape index: {}]   ;;  %s844_s7 = inlined_call_operand.hbm [shape: bf16[8,128], index: 7, kind: output, shape index: {}]  }
   0x1   :  { %13 = vsyncpa [#allocation6], 0 }
   0x2   :  { %14 = vsyncpa [#allocation9], 0 }
   0x3   :  { %15 = vsyncpa [#allocation4], 0  ;;  %s716_s24 = smov [#allocation5]   ;;  %s598_s28 = scalar_lea.hbm %s838_s1, 512 }
   0x4   :  { %s31_s25 = sshll.u32 %s716_s24, 4  ;;  %p599_p0 = scmp.ne.s32.totalorder %s838_s1, %s598_s28  ;;  %s32_s25 = int_to_ptr.vmem [resolvable:$true] %s31_s25 }
   0x5   :  { %p602_p1 = scmp.lt.u32.totalorder %s598_s28, %s838_s1 }
   0x7   :  { %p604_p2 = pnand %p602_p1, %p599_p0 }
   0x9   :  { %607 = shalt.err (!%p604_p2)
}
   0xa   :  { %s608_s10 = scalar_lea.vmem %s32_s25, 512  ;;  %p613_p4 = scmp.lt.s32.totalorder %s32_s25, %s32_s25 }
   0xb   :  { %p609_p3 = scmp.ne.s32.totalorder %s32_s25, %s608_s10  ;;  %p614_p5 = scmp.lt.s32.totalorder %s608_s10, %s608_s10 }
   0xd   :  { %p615_p6 = por %p614_p5, %p613_p4 }
   0xf   :  { %p616_p7 = pnand %p615_p6, %p609_p3 }
  0x11   :  { %619 = shalt.err (!%p616_p7)
}
  0x12   :  { %s717_s11 = smov 128   ;;  %s718_s12 = smov 8  }
  0x13   :  { %37 = dma.hbm_to_vmem [thread:$0]  %s838_s1, 512, %s32_s25, [#allocation6], %s717_s11, %s717_s11, %s718_s12  }
  0x14   :  { %s719_s15 = smov [#allocation2]   ;;  %s720_s17 = smov [#allocation7]  }
  0x15   :  { %s22_s16 = sshll.u32 %s719_s15, 4  ;;  %s45_s18 = sshll.u32 %s720_s17, 4  ;;  %s23_s16 = int_to_ptr.vmem [resolvable:$true] %s22_s16  ;;  %s46_s18 = int_to_ptr.vmem [resolvable:$true] %s45_s18 }
  0x16   :  { %s620_s21 = scalar_lea.hbm %s837_s0, 64 }
  0x17   :  { %p621_p8 = scmp.ne.s32.totalorder %s837_s0, %s620_s21  ;;  %p624_p9 = scmp.lt.u32.totalorder %s620_s21, %s837_s0 }
  0x19   :  { %p626_p10 = pnand %p624_p9, %p621_p8 }
  0x1b   :  { %629 = shalt.err (!%p626_p10)
}
  0x1c   :  { %s630_s1 = scalar_lea.vmem %s23_s16, 64  ;;  %p635_p12 = scmp.lt.s32.totalorder %s23_s16, %s23_s16 }
  0x1d   :  { %p631_p11 = scmp.ne.s32.totalorder %s23_s16, %s630_s1  ;;  %p636_p13 = scmp.lt.s32.totalorder %s630_s1, %s630_s1 }
  0x1f   :  { %p637_p0 = por %p636_p13, %p635_p12 }
  0x21   :  { %p638_p1 = pnand %p637_p0, %p631_p11 }
  0x23   :  { %641 = shalt.err (!%p638_p1)
}
  0x24   :  { %25 = dma.hbm_to_vmem [thread:$0]  %s837_s0, 64, %s23_s16, [#allocation3]  }
  0x25   :  { %s642_s30 = scalar_lea.hbm %s840_s3, 2048 }
  0x26   :  { %p643_p2 = scmp.ne.s32.totalorder %s840_s3, %s642_s30  ;;  %p646_p3 = scmp.lt.u32.totalorder %s642_s30, %s840_s3 }
  0x28   :  { %p648_p4 = pnand %p646_p3, %p643_p2 }
  0x2a   :  { %651 = shalt.err (!%p648_p4)
}
  0x2b   :  { %s652_s12 = scalar_lea.vmem %s46_s18, 2048  ;;  %p657_p6 = scmp.lt.s32.totalorder %s46_s18, %s46_s18 }
  0x2c   :  { %p653_p5 = scmp.ne.s32.totalorder %s46_s18, %s652_s12  ;;  %p658_p7 = scmp.lt.s32.totalorder %s652_s12, %s652_s12 }
  0x2e   :  { %p659_p8 = por %p658_p7, %p657_p6 }
  0x30   :  { %p660_p9 = pnand %p659_p8, %p653_p5 }
  0x32   :  { %663 = shalt.err (!%p660_p9)
}
  0x33   :  { %s721_s0 = smov 64   ;;  %s722_s13 = smov 4  }
  0x34   :  { %51 = dma.hbm_to_vmem [thread:$0]  %s840_s3, 2048, %s46_s18, [#allocation6], %s721_s0, %s721_s0, %s722_s13  }
  0x35   :  { %s723_s16 = smov [#allocation8]   ;;  %s664_s21 = scalar_lea.hbm %s842_s5, 1024 }
  0x36   :  { %s59_s17 = sshll.u32 %s723_s16, 4  ;;  %p665_p10 = scmp.ne.s32.totalorder %s842_s5, %s664_s21  ;;  %s60_s17 = int_to_ptr.vmem [resolvable:$true] %s59_s17 }
  0x37   :  { %p668_p11 = scmp.lt.u32.totalorder %s664_s21, %s842_s5 }
  0x39   :  { %p670_p12 = pnand %p668_p11, %p665_p10 }
  0x3b   :  { %673 = shalt.err (!%p670_p12)
}
  0x3c   :  { %s674_s1 = scalar_lea.vmem %s60_s17, 1024  ;;  %p679_p0 = scmp.lt.s32.totalorder %s60_s17, %s60_s17 }
  0x3d   :  { %p675_p13 = scmp.ne.s32.totalorder %s60_s17, %s674_s1  ;;  %p680_p1 = scmp.lt.s32.totalorder %s674_s1, %s674_s1 }
  0x3f   :  { %p681_p2 = por %p680_p1, %p679_p0 }
  0x41   :  { %p682_p3 = pnand %p681_p2, %p675_p13 }
  0x43   :  { %685 = shalt.err (!%p682_p3)
}
  0x44   :  { %65 = dma.hbm_to_vmem [thread:$0]  %s842_s5, 1024, %s60_s17, [#allocation9], %s721_s0, %s721_s0, %s722_s13  }
  0x45   :  { %708 = dma.done.wait [#allocation3], 64  }
  0x46   :  { %709 = vsyncadd [#allocation3], 4294967232 }
  0x47   :  { %710 = dma.done.wait [#allocation6], 2560  }
  0x48   :  { %711 = vsyncadd [#allocation6], 4294964736 }
  0x49   :  { %712 = dma.done.wait [#allocation9], 1024  }
  0x4a   :  { %713 = vsyncadd [#allocation9], 4294966272  ;;  %v724_v0 = vmov 0   ;;  %v568_v1 = vld [vmem:[#allocation5 + $0x4] ss:$8 sps:$4 sm:$0xff]   ;;  %vm118_vm0 = vcmask 261120   ;;  %v88_v29 = vlaneseq }
  0x4b   :  { %154 = vmatprep.mubr.bf16.mxu0 %v724_v0  ;;  %v570_v2 = vld [vmem:[#allocation5] ss:$8 sps:$4 sm:$0xff]   ;;  %122 = vmatprep.subr.bf16.mxu0 %v568_v1  ;;  %v571_v3 = vld [vmem:[#allocation5 + $0x14] ss:$8 sps:$4 sm:$0xff]   ;;  %v573_v4 = vld [vmem:[#allocation5 + $0x10] ss:$8 sps:$4 sm:$0xff]  }
  0x4c   :  { %123 = vmatpush1.bf16.msra.mxu0 %v570_v2  ;;  %v574_v5 = vld [vmem:[#allocation7 + $0x40] sm:$0xff]   ;;  %v81_v7 = vld [vmem:[#allocation2] sm:$0xf]  ;;  %v576_v8 = vld [vmem:[#allocation7 + $0x48] sm:$0xff]   ;;  %v725_v23 = vmov 0.0   ;;  %v89_v30 = vshrl.u32 %v88_v29, 7 }
  0x4d   :  { %124 = vmatprep.subr.bf16.mxu0 %v571_v3  ;;  %v575_v6 = vld [vmem:[#allocation7] sm:$0xff]   ;;  %505 = vmatprep.subr.bf16.mxu1 %v574_v5  ;;  %v577_v9 = vld [vmem:[#allocation7 + $0x8] sm:$0xff]   ;;  %v578_v10 = vld [vmem:[#allocation7 + $0x50] sm:$0xff]   ;;  %vm726_vm1 = vmmov 0   ;;  %s727_s30 = smov [#allocation10]  }
  0x4e   :  { %506 = vmatpush3.bf16.msra.mxu1 %v575_v6  ;;  %v579_v11 = vld [vmem:[#allocation7 + $0x10] sm:$0xff]   ;;  %v580_v12 = vld [vmem:[#allocation7 + $0x58] sm:$0xff]   ;;  %v582_v14 = vld [vmem:[#allocation7 + $0x60] sm:$0xff]   ;;  %v90_v31 = vsub.s32 0, %v89_v30  ;;  %v94_v33 = vsub.s32 1, %v89_v30  ;;  %s463_s8 = sshll.u32 %s727_s30, 4  ;;  %s464_s8 = int_to_ptr.vmem [resolvable:$true] %s463_s8 }
  0x4f   :  { %507 = vmatprep.subr.bf16.mxu1 %v576_v8  ;;  %v581_v13 = vld [vmem:[#allocation7 + $0x18] sm:$0xff]   ;;  %v583_v15 = vld [vmem:[#allocation7 + $0x20] sm:$0xff]   ;;  %v584_v16 = vld [vmem:[#allocation7 + $0x68] sm:$0xff]   ;;  %p691_p5 = scmp.lt.s32.totalorder %s464_s8, %s464_s8 }
  0x50   :  { %125 = vmatpush1.bf16.msra.mxu0 %v573_v4  ;;  %v585_v17 = vld [vmem:[#allocation7 + $0x28] sm:$0xff]   ;;  %v586_v18 = vld [vmem:[#allocation7 + $0x70] sm:$0xff]   ;;  %v588_v20 = vld [vmem:[#allocation7 + $0x78] sm:$0xff]  }
  0x51   :  { %v587_v19 = vld [vmem:[#allocation7 + $0x30] sm:$0xff]   ;;  %v589_v21 = vld [vmem:[#allocation7 + $0x38] sm:$0xff]   ;;  %v590_v22 = vld [vmem:[#allocation8] sm:$0xff]   ;;  %536 = vmatprep.subr.bf16.mxu0 %v725_v23 }
  0x52   :  { %508 = vmatpush3.bf16.msra.mxu1 %v577_v9  ;;  %v591_v24 = vld [vmem:[#allocation8 + $0x8] sm:$0xff]   ;;  %v592_v25 = vld [vmem:[#allocation8 + $0x10] sm:$0xff]   ;;  %v593_v26 = vld [vmem:[#allocation8 + $0x18] sm:$0xff]  }
  0x53   :  { %478 = vmatmul.mubr.msk.bf16.vlgmr.msra.gmra.mrb[0].mxu0 %vm118_vm0, %v81_v7  ;;  %509 = vmatprep.subr.bf16.mxu1 %v578_v10  ;;  %v594_v27 = vld [vmem:[#allocation8 + $0x20] sm:$0xff]   ;;  %v595_v28 = vld [vmem:[#allocation8 + $0x28] sm:$0xff]   ;;  %v86_v32 = vld [vmem:[%s839_s2] sm:$0x3] }
  0x54   :  { %537 = vmatpush3.bf16.msra.mxu0 %v590_v22  ;;  %v91_v34 = vrot.slane %v86_v32, %v90_v31  ;;  %v95_v35 = vrot.slane %v86_v32, %v94_v33  ;;  %v596_v46 = vld [vmem:[#allocation8 + $0x30] sm:$0xff]   ;;  %v597_v47 = vld [vmem:[#allocation8 + $0x38] sm:$0xff]   ;;  %552 = vmatprep.mubr.msk.bf16.mxu0 %vm726_vm1, %v725_v23 }
  0x55   :  { %538 = vmatprep.subr.bf16.mxu0 %v725_v23  ;;  %v479_v49 = vld [vmem:[%s841_s4] ss:$0 sm:$0xff]  ;;  %s686_s4 = scalar_lea.vmem %s464_s8, 64 }
  0x56   :  { %510 = vmatpush3.bf16.msra.mxu1 %v579_v11  ;;  %v496_v57 = vld [vmem:[%s843_s6] ss:$0 sm:$0xff]  ;;  %p687_p4 = scmp.ne.s32.totalorder %s464_s8, %s686_s4  ;;  %p692_p6 = scmp.lt.s32.totalorder %s686_s4, %s686_s4 }
  0x57   :  { %511 = vmatprep.subr.bf16.mxu1 %v580_v12 }
  0x58   :  { %539 = vmatpush3.bf16.msra.mxu0 %v591_v24  ;;  %p693_p7 = por %p692_p6, %p691_p5 }
  0x59   :  { %540 = vmatprep.subr.bf16.mxu0 %v725_v23 }
  0x5a   :  { %512 = vmatpush3.bf16.msra.mxu1 %v581_v13  ;;  %p694_p8 = pnand %p693_p7, %p687_p4 }
  0x5b   :  { %513 = vmatprep.subr.bf16.mxu1 %v582_v14 }
  0x5c   :  { %541 = vmatpush3.bf16.msra.mxu0 %v592_v25 }
  0x5d   :  { %542 = vmatprep.subr.bf16.mxu0 %v725_v23 }
  0x5e   :  { %514 = vmatpush3.bf16.msra.mxu1 %v583_v15 }
  0x5f   :  { %515 = vmatprep.subr.bf16.mxu1 %v584_v16 }
  0x60   :  { %543 = vmatpush3.bf16.msra.mxu0 %v593_v26 }
  0x61   :  { %544 = vmatprep.subr.bf16.mxu0 %v725_v23 }
  0x62   :  { %516 = vmatpush3.bf16.msra.mxu1 %v585_v17 }
  0x63   :  { %517 = vmatprep.subr.bf16.mxu1 %v586_v18 }
  0x64   :  { %545 = vmatpush3.bf16.msra.mxu0 %v594_v27 }
  0x65   :  { %546 = vmatprep.subr.bf16.mxu0 %v725_v23 }
  0x66   :  { %518 = vmatpush3.bf16.msra.mxu1 %v587_v19 }
  0x67   :  { %519 = vmatprep.subr.bf16.mxu1 %v588_v20 }
  0x68   :  { %547 = vmatpush3.bf16.msra.mxu0 %v595_v28 }
  0x69   :  { %548 = vmatprep.subr.bf16.mxu0 %v725_v23 }
  0x6a   :  { %520 = vmatpush3.bf16.msra.mxu1 %v589_v21 }
  0x6c   :  { %549 = vmatpush3.bf16.msra.mxu0 %v596_v46 }
  0x6d   :  { %550 = vmatprep.subr.bf16.mxu0 %v725_v23 }
  0x70   :  { %551 = vmatpush3.bf16.msra.mxu0 %v597_v47 }
 0x126   :  { %v156_v36 = vpop.f32.mrb[0].mxu0 }
 0x127   :  { %v157_v37 = vadd.f32 %v156_v36, %v91_v34  ;;  %v158_v38 = vpop.f32.mrb[1].mxu0 }
 0x128   :  { %v159_v39 = vadd.f32 %v158_v38, %v95_v35  ;;  %v160_v40 = vpop.f32.mrb[2].mxu0 }
 0x129   :  { %v163_v41 = vmax.f32 %v157_v37, 0.0  ;;  %v161_v42 = vpop.f32.mrb[3].mxu0 }
 0x12a   :  { %v164_v43 = vmax.f32 %v159_v39, 0.0 }
 0x12b   :  { %v165_v45 = vpack.c.bf16 %v163_v41, %v163_v41 }
 0x12c   :  { %v166_v44 = vpack.c.bf16 %v164_v43, %v164_v43 }
 0x12e   :  { %334 = vmatprep.mubr.bf16.mxu1 %v166_v44 }
 0x12f   :  { %335 = vmatmul.mubr.bf16.vlgmr.msra.gmra.mrb[0].mxu1 %v165_v45 }
 0x202   :  { %v521_v48 = vpop.f32.mrb[0].mxu1 }
 0x203   :  { %v522_v50 = vpop.f32.mrb[1].mxu1 }
 0x204   :  { %v523_v51 = vadd.f32 %v522_v50, %v521_v48  ;;  %v524_v52 = vpop.f32.mrb[2].mxu1 }
 0x205   :  { %v525_v53 = vpop.f32.mrb[3].mxu1 }
 0x206   :  { %v337_v54 = vadd.f32 %v523_v51, %v479_v49 }
 0x208   :  { %v342_v55 = vmax.f32 %v337_v54, 0.0 }
 0x20a   :  { %v343_v56 = vpack.c.bf16 %v342_v55, %v342_v55 }
 0x20c   :  { %553 = vmatmul.mubr.bf16.vlgmr.msra.gmra.mrb[4].mxu0 %v343_v56 }
 0x2df   :  { %v449_v58 = vpop.f32.mrb[4].mxu0 }
 0x2e0   :  { %v450_v59 = vadd.f32 %v496_v57, %v449_v58  ;;  %v554_v60 = vpop.f32.mrb[5].mxu0 }
 0x2e1   :  { %v452_v61 = vpop.f32.mrb[6].mxu0 }
 0x2e2   :  { %v455_v62 = vpack.c.bf16 %v450_v59, %v450_v59  ;;  %v555_v63 = vpop.f32.mrb[7].mxu0 }
 0x2e4   :  { %456 = vst [vmem:[#allocation10] sm:$0xf] %v455_v62 }
 0x2e5   :  { %697 = shalt.err (!%p694_p8)
}
 0x2e6   :  { %s698_s6 = scalar_lea.hbm %s844_s7, 64 }
 0x2e7   :  { %p699_p9 = scmp.ne.s32.totalorder %s844_s7, %s698_s6  ;;  %p702_p10 = scmp.lt.u32.totalorder %s698_s6, %s844_s7 }
 0x2e9   :  { %p704_p11 = pnand %p702_p10, %p699_p9 }
 0x2eb   :  { %707 = shalt.err (!%p704_p11)
}
 0x2ec   :  { %466 = dma.vmem_to_hbm [thread:$0]  %s464_s8, 64, %s844_s7, [#allocation4]  }
 0x2ed   :  { %714 = dma.done.wait [#allocation4], 64  }
 0x2ee   :  { %715 = vsyncadd [#allocation4], 4294967232 }
 0x2ef   :  { %470 = vsyncpa [#allocation3], 1 }
 0x2f0   :  { %471 = vsyncpa [#allocation6], 1 }
 0x2f1   :  { %472 = vsyncpa [#allocation9], 1 }
 0x2f2   :  { %473 = vsyncpa [#allocation4], 1 }

</bundles_post_ra>
